<compile_context>
chip_gen: v6e
topology: v6e:2x2x1
jax: 0.10.0
libtpu: 0.0.40
codegen_flags: <defaults>
</compile_context>

<pallas_src>
import functools

import jax
import jax.numpy as jnp
from jax.experimental import pallas as pl
from jax.experimental.pallas import tpu as pltpu

_LANE = 128


def _round_up(x, m):
    return ((x + m - 1) // m) * m


def _encoder_tagger_kernel(
    enc_ref,      # (tm, D_in)       bf16
    tag_ref,      # (tm, D_tag)      bf16
    w_enc_ref,    # (D_in, H_pad)    bf16
    b_enc_ref,    # (1, H_pad)       f32
    w_tag_s_ref,  # (H_pad, V_pad)   bf16
    w_tag_t_ref,  # (D_tag, V_pad)   bf16
    b_tag_ref,    # (1, V_pad)       f32
    out_ref,      # (tm, V_pad)      f32
):
    x = enc_ref[...]
    t = tag_ref[...]

    # ---- encoder: states = relu(x @ W_enc + b_enc), f32 epilogue ----
    states = jnp.dot(x, w_enc_ref[...], preferred_element_type=jnp.float32)
    states = jnp.maximum(states + b_enc_ref[...], 0.0)

    # ---- tagger: logits = [states, tag_in] @ W_tag + b_tag (split matmul) ----
    logits = jnp.dot(
        states.astype(jnp.bfloat16), w_tag_s_ref[...],
        preferred_element_type=jnp.float32,
    )
    logits = logits + jnp.dot(t, w_tag_t_ref[...],
                              preferred_element_type=jnp.float32)
    logits = logits + b_tag_ref[...]

    out_ref[...] = logits  # lane-dense f32 store (V_pad is a multiple of 128)


@functools.partial(jax.jit, static_argnames=("tm",))
def tagger_with_encoder(enc_inputs, tag_inputs, params, *, tm=512):
    """enc_inputs: (B,S,D_in), tag_inputs: (B,S,D_tag) -> logits (B,S,V)."""
    B, S, D_in = enc_inputs.shape
    _, _, D_tag = tag_inputs.shape
    w_enc, b_enc, w_tag_s, w_tag_t, b_tag = params
    H = w_enc.shape[1]
    V = w_tag_s.shape[1]
    M = B * S

    H_pad = _round_up(H, _LANE)
    V_pad = _round_up(V, _LANE)

    # Row tile: multiple of 8 sublanes, no larger than needed.
    tm_eff = min(_round_up(tm, 8), _round_up(M, 8))
    M_pad = pl.cdiv(M, tm_eff) * tm_eff
    n_tiles = M_pad // tm_eff

    # Activations: flatten, cast to bf16 (MXU operands), pad rows only.
    enc_flat = enc_inputs.reshape(M, D_in).astype(jnp.bfloat16)
    tag_flat = tag_inputs.reshape(M, D_tag).astype(jnp.bfloat16)
    if M_pad != M:
        enc_flat = jnp.pad(enc_flat, ((0, M_pad - M), (0, 0)))
        tag_flat = jnp.pad(tag_flat, ((0, M_pad - M), (0, 0)))

    # Weights: zero-pad H/V up to lane width (exact), cast matmul operands to bf16.
    w_enc_p = jnp.pad(w_enc, ((0, 0), (0, H_pad - H))).astype(jnp.bfloat16)
    b_enc_p = jnp.pad(b_enc, ((0, 0), (0, H_pad - H))).astype(jnp.float32)
    w_tag_s_p = jnp.pad(w_tag_s, ((0, H_pad - H), (0, V_pad - V))).astype(jnp.bfloat16)
    w_tag_t_p = jnp.pad(w_tag_t, ((0, 0), (0, V_pad - V))).astype(jnp.bfloat16)
    b_tag_p = jnp.pad(b_tag, ((0, 0), (0, V_pad - V))).astype(jnp.float32)

    row_map = lambda i: (i, 0)   # row-tiled operands
    res_map = lambda i: (0, 0)   # resident (weights / biases)

    in_specs = [
        pl.BlockSpec((tm_eff, D_in), row_map),
        pl.BlockSpec((tm_eff, D_tag), row_map),
        pl.BlockSpec((D_in, H_pad), res_map),
        pl.BlockSpec((1, H_pad), res_map),
        pl.BlockSpec((H_pad, V_pad), res_map),
        pl.BlockSpec((D_tag, V_pad), res_map),
        pl.BlockSpec((1, V_pad), res_map),
    ]
    out_spec = pl.BlockSpec((tm_eff, V_pad), row_map)

    # VMEM budget (double-buffered tiles + resident weights + intermediates),
    # re-derived so it also fits v7x's 64 MiB physical VMEM.
    vmem_estimate = (
        2 * tm_eff * (D_in + D_tag) * 2          # input double buffers (bf16)
        + 2 * tm_eff * V_pad * 4                 # output double buffer (f32)
        + (D_in * H_pad + H_pad * V_pad + D_tag * V_pad) * 2  # weights (bf16)
        + (H_pad + V_pad) * 4                    # biases (f32)
        + tm_eff * (2 * H_pad + V_pad) * 4       # in-kernel intermediates
    )
    vmem_limit = int(min(max(4 * vmem_estimate, 32 * 1024 * 1024),
                         48 * 1024 * 1024))

    cost = pl.CostEstimate(
        flops=2 * M * (D_in * H + H * V + D_tag * V),
        transcendentals=0,
        bytes_accessed=(
            M * (D_in + D_tag) * 2
            + M * V_pad * 4
            + (D_in * H_pad + H_pad * V_pad + D_tag * V_pad) * 2
            + (H_pad + V_pad) * 4
        ),
    )

    out_flat = pl.pallas_call(
        _encoder_tagger_kernel,
        out_shape=jax.ShapeDtypeStruct((M_pad, V_pad), jnp.float32),
        grid=(n_tiles,),
        in_specs=in_specs,
        out_specs=out_spec,
        compiler_params=pltpu.CompilerParams(
            dimension_semantics=("parallel",),
            vmem_limit_bytes=vmem_limit,
        ),
        cost_estimate=cost,
    )(enc_flat, tag_flat, w_enc_p, b_enc_p, w_tag_s_p, w_tag_t_p, b_tag_p)

    return out_flat[:M, :V].reshape(B, S, V)


def init_params(key, d_in, h, d_tag, v):
    k1, k2, k3, k4 = jax.random.split(key, 4)
    w_enc = jax.random.normal(k1, (d_in, h), jnp.float32) * (1.0 / jnp.sqrt(d_in))
    b_enc = jnp.zeros((1, h), jnp.float32)
    w_tag_s = jax.random.normal(k2, (h, v), jnp.float32) * (1.0 / jnp.sqrt(h + d_tag))
    w_tag_t = jax.random.normal(k3, (d_tag, v), jnp.float32) * (1.0 / jnp.sqrt(h + d_tag))
    b_tag = jax.random.normal(k4, (1, v), jnp.float32) * 0.01
    return w_enc, b_enc, w_tag_s, w_tag_t, b_tag


def _reference(enc_inputs, tag_inputs, params):
    w_enc, b_enc, w_tag_s, w_tag_t, b_tag = params
    states = jnp.maximum(enc_inputs @ w_enc + b_enc[0], 0.0)
    return states @ w_tag_s + tag_inputs @ w_tag_t + b_tag[0]


if __name__ == "__main__":
    B, S = 2, 8          # batch, sequence length
    D_in, H = 32, 32     # encoder input dim, encoder hidden dim
    D_tag, V = 16, 16    # tagger feature dim, tag-vocab size

    key = jax.random.PRNGKey(0)
    k_enc, k_tag, k_params = jax.random.split(key, 3)

    enc_inputs = jax.random.normal(k_enc, (B, S, D_in), jnp.float32)
    tag_inputs = jax.random.normal(k_tag, (B, S, D_tag), jnp.float32)
    params = init_params(k_params, D_in, H, D_tag, V)

    logits = tagger_with_encoder(enc_inputs, tag_inputs, params)
    logits = jax.block_until_ready(logits)

    ref = _reference(enc_inputs, tag_inputs, params)
    assert logits.shape == (B, S, V), logits.shape
    # bf16 MXU operands (f32 accumulation) -> looser tolerance than pure f32.
    assert jnp.allclose(logits, ref, atol=5e-2, rtol=5e-2), "mismatch vs reference"

    print("KERNEL_OK")
</pallas_src>

<mosaic_0001>
module attributes {stable_mosaic.version = 11 : i64} {
  func.func @_encoder_tagger_kernel(%arg0: i32, %arg1: memref<16x32xbf16, #tpu.memory_space<vmem>>, %arg2: memref<16x16xbf16, #tpu.memory_space<vmem>>, %arg3: memref<32x128xbf16, #tpu.memory_space<vmem>>, %arg4: memref<1x128xf32, #tpu.memory_space<vmem>>, %arg5: memref<128x128xbf16, #tpu.memory_space<vmem>>, %arg6: memref<16x128xbf16, #tpu.memory_space<vmem>>, %arg7: memref<1x128xf32, #tpu.memory_space<vmem>>, %arg8: memref<16x128xf32, #tpu.memory_space<vmem>>) attributes {dimension_semantics = [#tpu.dimension_semantics<parallel>], iteration_bounds = array<i64: 1>, scalar_prefetch = 0 : i64, scratch_operands = 0 : i64, tpu.core_type = #tpu.core_type<tc>, window_params = [{transform_indices = @transform_0, window_bounds = array<i64: 16, 32>}, {transform_indices = @transform_1, window_bounds = array<i64: 16, 16>}, {pipeline_mode = #tpu.pipeline_mode<synchronous>, transform_indices = @transform_2, window_bounds = array<i64: 32, 128>}, {pipeline_mode = #tpu.pipeline_mode<synchronous>, transform_indices = @transform_3, window_bounds = array<i64: 1, 128>}, {pipeline_mode = #tpu.pipeline_mode<synchronous>, transform_indices = @transform_4, window_bounds = array<i64: 128, 128>}, {pipeline_mode = #tpu.pipeline_mode<synchronous>, transform_indices = @transform_5, window_bounds = array<i64: 16, 128>}, {pipeline_mode = #tpu.pipeline_mode<synchronous>, transform_indices = @transform_6, window_bounds = array<i64: 1, 128>}, {transform_indices = @transform_7, window_bounds = array<i64: 16, 128>}]} {
    %c0 = arith.constant 0 : index
    %c0_0 = arith.constant 0 : index
    %0 = vector.load %arg1[%c0, %c0_0] : memref<16x32xbf16, #tpu.memory_space<vmem>>, vector<16x32xbf16>
    %c0_1 = arith.constant 0 : index
    %c0_2 = arith.constant 0 : index
    %1 = vector.load %arg2[%c0_1, %c0_2] : memref<16x16xbf16, #tpu.memory_space<vmem>>, vector<16x16xbf16>
    %c0_3 = arith.constant 0 : index
    %c0_4 = arith.constant 0 : index
    %2 = vector.load %arg3[%c0_3, %c0_4] : memref<32x128xbf16, #tpu.memory_space<vmem>>, vector<32x128xbf16>
    %cst = arith.constant dense<0.000000e+00> : vector<16x128xf32>
    %3 = tpu.matmul %0, %2, %cst {dimension_numbers = #tpu.dot_dimension_numbers<[1], [0], [0], [1], [0, 0, 1, 1], [], []>} : vector<16x32xbf16>, vector<32x128xbf16>, vector<16x128xf32> -> vector<16x128xf32>
    %c0_5 = arith.constant 0 : index
    %c0_6 = arith.constant 0 : index
    %4 = vector.load %arg4[%c0_5, %c0_6] : memref<1x128xf32, #tpu.memory_space<vmem>>, vector<1x128xf32>
    %5 = vector.broadcast %4 : vector<1x128xf32> to vector<16x128xf32>
    %6 = arith.addf %3, %5 : vector<16x128xf32>
    %cst_7 = arith.constant 0.000000e+00 : f32
    %7 = vector.broadcast %cst_7 : f32 to vector<16x128xf32>
    %8 = arith.maximumf %6, %7 : vector<16x128xf32>
    %9 = arith.truncf %8 : vector<16x128xf32> to vector<16x128xbf16>
    %c0_8 = arith.constant 0 : index
    %c0_9 = arith.constant 0 : index
    %10 = vector.load %arg5[%c0_8, %c0_9] : memref<128x128xbf16, #tpu.memory_space<vmem>>, vector<128x128xbf16>
    %cst_10 = arith.constant dense<0.000000e+00> : vector<16x128xf32>
    %11 = tpu.matmul %9, %10, %cst_10 {dimension_numbers = #tpu.dot_dimension_numbers<[1], [0], [0], [1], [0, 0, 1, 1], [], []>} : vector<16x128xbf16>, vector<128x128xbf16>, vector<16x128xf32> -> vector<16x128xf32>
    %c0_11 = arith.constant 0 : index
    %c0_12 = arith.constant 0 : index
    %12 = vector.load %arg6[%c0_11, %c0_12] : memref<16x128xbf16, #tpu.memory_space<vmem>>, vector<16x128xbf16>
    %cst_13 = arith.constant dense<0.000000e+00> : vector<16x128xf32>
    %13 = tpu.matmul %1, %12, %cst_13 {dimension_numbers = #tpu.dot_dimension_numbers<[1], [0], [0], [1], [0, 0, 1, 1], [], []>} : vector<16x16xbf16>, vector<16x128xbf16>, vector<16x128xf32> -> vector<16x128xf32>
    %14 = arith.addf %11, %13 : vector<16x128xf32>
    %c0_14 = arith.constant 0 : index
    %c0_15 = arith.constant 0 : index
    %15 = vector.load %arg7[%c0_14, %c0_15] : memref<1x128xf32, #tpu.memory_space<vmem>>, vector<1x128xf32>
    %16 = vector.broadcast %15 : vector<1x128xf32> to vector<16x128xf32>
    %17 = arith.addf %14, %16 : vector<16x128xf32>
    %c0_16 = arith.constant 0 : index
    %c0_17 = arith.constant 0 : index
    %18 = vector.load %arg8[%c0_16, %c0_17] : memref<16x128xf32, #tpu.memory_space<vmem>>, vector<16x128xf32>
    tpu.vector_store %arg8[%c0_16, %c0_17], %17 {strides = array<i32>} : memref<16x128xf32, #tpu.memory_space<vmem>>, vector<16x128xf32>,
    return
  }
  func.func @transform_0(%arg0: i32) -> (i32, i32) {
    %c0_i32 = arith.constant 0 : i32
    %c0_i32_0 = arith.constant 0 : i32
    return %arg0, %c0_i32 : i32, i32
  }
  func.func @transform_1(%arg0: i32) -> (i32, i32) {
    %c0_i32 = arith.constant 0 : i32
    %c0_i32_0 = arith.constant 0 : i32
    return %arg0, %c0_i32 : i32, i32
  }
  func.func @transform_2(%arg0: i32) -> (i32, i32) {
    %c0_i32 = arith.constant 0 : i32
    %c0_i32_0 = arith.constant 0 : i32
    %c0_i32_1 = arith.constant 0 : i32
    return %c0_i32, %c0_i32_0 : i32, i32
  }
  func.func @transform_3(%arg0: i32) -> (i32, i32) {
    %c0_i32 = arith.constant 0 : i32
    %c0_i32_0 = arith.constant 0 : i32
    %c0_i32_1 = arith.constant 0 : i32
    return %c0_i32, %c0_i32_0 : i32, i32
  }
  func.func @transform_4(%arg0: i32) -> (i32, i32) {
    %c0_i32 = arith.constant 0 : i32
    %c0_i32_0 = arith.constant 0 : i32
    %c0_i32_1 = arith.constant 0 : i32
    return %c0_i32, %c0_i32_0 : i32, i32
  }
  func.func @transform_5(%arg0: i32) -> (i32, i32) {
    %c0_i32 = arith.constant 0 : i32
    %c0_i32_0 = arith.constant 0 : i32
    %c0_i32_1 = arith.constant 0 : i32
    return %c0_i32, %c0_i32_0 : i32, i32
  }
  func.func @transform_6(%arg0: i32) -> (i32, i32) {
    %c0_i32 = arith.constant 0 : i32
    %c0_i32_0 = arith.constant 0 : i32
    %c0_i32_1 = arith.constant 0 : i32
    return %c0_i32, %c0_i32_0 : i32, i32
  }
  func.func @transform_7(%arg0: i32) -> (i32, i32) {
    %c0_i32 = arith.constant 0 : i32
    %c0_i32_0 = arith.constant 0 : i32
    return %arg0, %c0_i32 : i32, i32
  }
}

</mosaic_0001>

<bundles_post_ra>
// kernel: tagger_with_encoder.1
= control target key start
LH: loop header
LB: loop body
LE: loop exit
PB: predicated region body
PF: predicated region fallthrough
CT: control target
= control target key end

     0   :  { %v365_v0 = vmov 0.0   ;;  %vm366_vm0 = vmmov 0   ;;  %vm59_vm1 = vcmask 261120   ;;  %vm136_vm2 = vcmask 130048   ;;  %s461_s2 = inlined_call_operand.vmem [shape: bf16[32,128], index: 2, kind: input, shape index: {}]   ;;  %s462_s4 = inlined_call_operand.vmem [shape: bf16[128,128], index: 4, kind: input, shape index: {}]   ;;  %s463_s0 = inlined_call_operand.vmem [shape: bf16[16,32], index: 0, kind: input, shape index: {}]   ;;  %s464_s5 = inlined_call_operand.vmem [shape: bf16[16,128], index: 5, kind: input, shape index: {}]   ;;  %s465_s1 = inlined_call_operand.vmem [shape: bf16[16,16], index: 1, kind: input, shape index: {}]   ;;  %s466_s3 = inlined_call_operand.vmem [shape: f32[1,128], index: 3, kind: input, shape index: {}]   ;;  %s467_s6 = inlined_call_operand.vmem [shape: f32[1,128], index: 6, kind: input, shape index: {}]   ;;  %s468_s7 = inlined_call_operand.vmem [shape: f32[16,128], index: 7, kind: output, shape index: {}]  }
   0x1   :  { %316 = vmatprep.subr.bf16.mxu0 %v365_v0  ;;  %v352_v1 = vld [vmem:[%s461_s2 + $0x8] sm:$0xff]   ;;  %320 = vmatprep.mubr.msk.bf16.mxu0 %vm366_vm0, %v365_v0  ;;  %v353_v2 = vld [vmem:[%s461_s2] sm:$0xff]   ;;  %v355_v3 = vld [vmem:[%s462_s4 + $0x38] sm:$0xff]  }
   0x2   :  { %330 = vmatprep.subr.bf16.mxu1 %v365_v0  ;;  %346 = vmatprep.mubr.msk.bf16.mxu1 %vm366_vm0, %v365_v0  ;;  %v354_v4 = vld [vmem:[%s463_s0] sm:$0xff]   ;;  %v356_v5 = vld [vmem:[%s462_s4 + $0x30] sm:$0xff]   ;;  %v357_v6 = vld [vmem:[%s462_s4 + $0x28] sm:$0xff]  }
   0x3   :  { %317 = vmatpush3.bf16.msra.mxu0 %v352_v1  ;;  %331 = vmatpush3.bf16.msra.mxu1 %v355_v3  ;;  %v358_v7 = vld [vmem:[%s462_s4 + $0x20] sm:$0xff]   ;;  %v359_v8 = vld [vmem:[%s462_s4 + $0x18] sm:$0xff]   ;;  %v360_v9 = vld [vmem:[%s462_s4 + $0x10] sm:$0xff]  }
   0x4   :  { %318 = vmatprep.subr.bf16.mxu0 %v365_v0  ;;  %332 = vmatprep.subr.bf16.mxu1 %v365_v0  ;;  %v361_v10 = vld [vmem:[%s464_s5] sm:$0xff]   ;;  %v362_v11 = vld [vmem:[%s462_s4 + $0x8] sm:$0xff]  }
   0x5   :  { %v363_v12 = vld [vmem:[%s465_s1] sm:$0xff]  }
   0x6   :  { %v364_v13 = vld [vmem:[%s462_s4] sm:$0xff]  }
   0x7   :  { %319 = vmatpush3.bf16.msra.mxu0 %v353_v2  ;;  %333 = vmatpush3.bf16.msra.mxu1 %v356_v5  ;;  %v285_v14 = vld [vmem:[%s466_s3] ss:$0 sm:$0xff] }
   0x8   :  { %324 = vmatprep.subr.bf16.mxu0 %v365_v0  ;;  %334 = vmatprep.subr.bf16.mxu1 %v365_v0  ;;  %v301_v29 = vld [vmem:[%s467_s6] ss:$0 sm:$0xff] }
   0xa   :  { %321 = vmatmul.mubr.msk.bf16.vlgmr.msra.gmra.mxu0 %vm59_vm1, %v354_v4 }
   0xb   :  { %326 = vmatprep.mubr.msk.bf16.mxu0 %vm366_vm0, %v365_v0  ;;  %335 = vmatpush3.bf16.msra.mxu1 %v357_v6 }
   0xc   :  { %336 = vmatprep.subr.bf16.mxu1 %v365_v0  ;;  %325 = vmatpush3.bf16.msra.mxu0 %v361_v10 }
   0xf   :  { %337 = vmatpush3.bf16.msra.mxu1 %v358_v7 }
  0x10   :  { %338 = vmatprep.subr.bf16.mxu1 %v365_v0 }
  0x12   :  { %327 = vmatmul.mubr.msk.bf16.vlgmr.msra.gmra.mxu0 %vm136_vm2, %v363_v12 }
  0x13   :  { %339 = vmatpush3.bf16.msra.mxu1 %v359_v8 }
  0x14   :  { %340 = vmatprep.subr.bf16.mxu1 %v365_v0 }
  0x17   :  { %341 = vmatpush3.bf16.msra.mxu1 %v360_v9 }
  0x18   :  { %342 = vmatprep.subr.bf16.mxu1 %v365_v0 }
  0x1b   :  { %343 = vmatpush3.bf16.msra.mxu1 %v362_v11 }
  0x1c   :  { %344 = vmatprep.subr.bf16.mxu1 %v365_v0 }
  0x1f   :  { %345 = vmatpush3.bf16.msra.mxu1 %v364_v13 }
  0xca   :  { %v97_v15 = vpop.f32.mrf.mxu0 }
  0xcb   :  { %v98_v17 = vadd.f32 %v285_v14, %v97_v15 }
  0xcc   :  { %v322_v16 = vpop.f32.mrf.mxu0 }
  0xcd   :  { %v104_v21 = vmax.f32 %v98_v17, 0.0 }
  0xce   :  { %v100_v18 = vpop.f32.mrf.mxu0 }
  0xcf   :  { %v101_v19 = vadd.f32 %v285_v14, %v100_v18 }
  0xd0   :  { %v323_v20 = vpop.f32.mrf.mxu0 }
  0xd1   :  { %v105_v22 = vmax.f32 %v101_v19, 0.0 }
  0xd2   :  { %v174_v24 = vpop.f32.mrf.mxu0 }
  0xd3   :  { %v106_v23 = vpack.c.bf16 %v105_v22, %v104_v21 }
  0xd4   :  { %v328_v25 = vpop.f32.mrf.mxu0 }
  0xd5   :  { %347 = vmatmul.mubr.bf16.vlgmr.msra.gmra.mxu1 %v106_v23 }
  0xd6   :  { %v177_v26 = vpop.f32.mrf.mxu0 }
  0xd8   :  { %v329_v27 = vpop.f32.mrf.mxu0 }
 0x195   :  { %v263_v28 = vpop.f32.mrf.mxu1 }
 0x196   :  { %v264_v30 = vadd.f32 %v263_v28, %v174_v24 }
 0x197   :  { %v348_v31 = vpop.f32.mrf.mxu1 }
 0x198   :  { %v277_v32 = vadd.f32 %v301_v29, %v264_v30 }
 0x199   :  { %v266_v33 = vpop.f32.mrf.mxu1 }
 0x19a   :  { %279 = vst [vmem:[%s468_s7] sm:$0xff] %v277_v32  ;;  %v267_v34 = vadd.f32 %v266_v33, %v177_v26 }
 0x19b   :  { %v349_v35 = vpop.f32.mrf.mxu1 }
 0x19c   :  { %v278_v36 = vadd.f32 %v301_v29, %v267_v34 }
 0x19e   :  { %280 = vst [vmem:[%s468_s7 + $0x8] sm:$0xff] %v278_v36 }

</bundles_post_ra>
